<compile_context>
chip_gen: v6e
topology: v6e:2x2x1
jax: 0.10.0
libtpu: 0.0.40
codegen_flags: <defaults>
</compile_context>

<pallas_src>
import functools
import math

import jax
import jax.numpy as jnp
from jax import lax
from jax.experimental import pallas as pl
from jax.experimental.pallas import tpu as pltpu


def _round_up(x, m):
    return (x + m - 1) // m * m


def _fast_recip(x):
    # EUP approximate reciprocal (free slot) + one Newton-Raphson step -> ~f32
    # accuracy while keeping the divide off the VALU slots.
    r = pl.reciprocal(x, approx=True)
    return r * (2.0 - x * r)


# --------------------------------------------------------------------------
# 1) Fused QKV projection: outs[p] = xs[p] @ ws[p] + bs[p]   (one pipeline)
# --------------------------------------------------------------------------
def _batched_matmul_bias_kernel(x_ref, w_ref, b_ref, o_ref, acc_ref):
    @pl.when(pl.program_id(3) == 0)
    def _():
        acc_ref[...] = jnp.zeros_like(acc_ref)

    # DEFAULT precision: single-pass bf16 MXU with f32 accumulate.
    acc_ref[...] += jnp.dot(x_ref[0], w_ref[0], preferred_element_type=jnp.float32)

    @pl.when(pl.program_id(3) == pl.num_programs(3) - 1)
    def _():
        o_ref[0] = (acc_ref[...] + b_ref[0].astype(jnp.float32)).astype(o_ref.dtype)


def batched_linear(xs, ws, bs, *, tm=256, tn=256, tk=1024):
    """xs: (P, M, K), ws: (P, K, N), bs: (P, 1, N) -> (P, M, N).

    One pallas_call for all P projections (grid axis p), reduction axis innermost,
    (8,128)-aligned padding done once. Tiles are v7x/v5e-safe (~5 MiB footprint);
    on v6e they can be grown (tm/tn -> 512) with a larger vmem_limit_bytes.
    """
    P, M, K = xs.shape
    _, _, N = ws.shape
    tm = min(tm, _round_up(M, 8))
    tn = min(tn, _round_up(N, 128))
    tk = min(tk, _round_up(K, 128))
    Mp, Kp, Np = _round_up(M, tm), _round_up(K, tk), _round_up(N, tn)

    # NOTE: in a real deployment, pack/pad the weights once at parameter-load
    # time instead of per forward call; the activation is padded once here.
    xs = jnp.pad(xs, ((0, 0), (0, Mp - M), (0, Kp - K)))   # zero K-pad is exact
    ws = jnp.pad(ws, ((0, 0), (0, Kp - K), (0, Np - N)))
    bs = jnp.pad(bs, ((0, 0), (0, 0), (0, Np - N)))

    out = pl.pallas_call(
        _batched_matmul_bias_kernel,
        out_shape=jax.ShapeDtypeStruct((P, Mp, Np), xs.dtype),
        grid_spec=pltpu.PrefetchScalarGridSpec(
            num_scalar_prefetch=0,
            grid=(P, Mp // tm, Np // tn, Kp // tk),        # reduction innermost
            in_specs=[
                pl.BlockSpec((1, tm, tk), lambda p, i, j, k: (p, i, k)),
                pl.BlockSpec((1, tk, tn), lambda p, i, j, k: (p, k, j)),
                pl.BlockSpec((1, 1, tn), lambda p, i, j, k: (p, 0, j)),
            ],
            out_specs=pl.BlockSpec((1, tm, tn), lambda p, i, j, k: (p, i, j)),
            scratch_shapes=[pltpu.VMEM((tm, tn), jnp.float32)],
        ),
        compiler_params=pltpu.CompilerParams(
            dimension_semantics=("parallel", "parallel", "parallel", "arbitrary"),
            vmem_limit_bytes=32 * 1024 * 1024,
        ),
    )(xs, ws, bs)
    return out[:, :M, :N]


def qkv_projection(xq, xk, xv, params):
    """Fused Q/K/V projection.

    Self-attention (xq is xk is xv): ONE matmul with weights concatenated along N
    (activation read from HBM once). Otherwise (cross-attention style): the three
    projections are stacked along a leading grid axis -> one pallas_call pipeline,
    one pad, each distinct activation streamed once.
    """
    d = params["wq"].shape[0]
    if xq is xk and xk is xv:
        w = jnp.concatenate([params["wq"], params["wk"], params["wv"]], axis=1)  # (D, 3D)
        b = jnp.concatenate([params["bq"], params["bk"], params["bv"]])          # (3D,)
        out = batched_linear(xq[None], w[None], b[None, None])[0]                # (M, 3D)
        return out[:, :d], out[:, d:2 * d], out[:, 2 * d:]
    w = jnp.stack([params["wq"], params["wk"], params["wv"]])                    # (3, D, D)
    b = jnp.stack([params["bq"], params["bk"], params["bv"]])[:, None, :]        # (3, 1, D)
    x = jnp.stack([xq, xk, xv])                                                  # (3, M, D)
    out = batched_linear(x, w, b)
    return out[0], out[1], out[2]


# --------------------------------------------------------------------------
# 2) Flash attention on the (B, S, H*hd) layout (no HBM head transposes)
# --------------------------------------------------------------------------
def _heads_per_block(num_heads, head_size):
    """Heads per grid block so the last block dim is a multiple of 128 (lane-dense)
    or equals the full feature dim (always legal)."""
    d = num_heads * head_size
    if d % 128 != 0:
        return num_heads
    hb = 1
    while (hb * head_size) % 128 != 0 or num_heads % hb != 0:
        hb += 1
    return hb


def _flash_attention_kernel(q_ref, k_ref, v_ref, o_ref, m_sc, l_sc, acc_sc, *,
                            scale, causal, hb, hd, tq, tkv, s_valid, kpad):
    qi = pl.program_id(2)
    ki = pl.program_id(3)

    @pl.when(ki == 0)
    def _():
        m_sc[...] = jnp.full_like(m_sc, -jnp.inf)
        l_sc[...] = jnp.zeros_like(l_sc)
        acc_sc[...] = jnp.zeros_like(acc_sc)

    def tile_update(apply_causal_mask):
        # 1/sqrt(hd) folded into q (S*D multiplies instead of S^2).
        q = q_ref[0].astype(jnp.float32) * scale       # (tq, hb*hd)
        k = k_ref[0].astype(jnp.float32)               # (tkv, hb*hd)
        v = v_ref[0]                                   # (tkv, hb*hd) original dtype

        mask = None
        if apply_causal_mask:                          # only traced on diagonal tiles
            q_pos = qi * tq + lax.broadcasted_iota(jnp.int32, (tq, tkv), 0)
            k_pos = ki * tkv + lax.broadcasted_iota(jnp.int32, (tq, tkv), 1)
            mask = k_pos <= q_pos
        if kpad:                                       # key padding (static flag)
            k_pos = ki * tkv + lax.broadcasted_iota(jnp.int32, (tq, tkv), 1)
            valid = k_pos < s_valid
            mask = valid if mask is None else jnp.logical_and(mask, valid)

        for h in range(hb):                            # static unroll over heads
            sl = slice(h * hd, (h + 1) * hd)
            s = lax.dot_general(q[:, sl], k[:, sl], (((1,), (1,)), ((), ())),
                                preferred_element_type=jnp.float32)   # (tq, tkv)
            if mask is not None:
                # exact PyTorch fill value (masked_fill with -1e9 after scaling)
                s = jnp.where(mask, s, jnp.float32(-1e9))
            m_prev = m_sc[h]
            m_new = jnp.maximum(m_prev, jnp.max(s, axis=-1, keepdims=True))
            alpha = jnp.exp(m_prev - m_new)
            p = jnp.exp(s - m_new)
            l_sc[h] = alpha * l_sc[h] + jnp.sum(p, axis=-1, keepdims=True)
            # P cast to V's dtype before the MXU matmul (halves passes when V=bf16).
            acc_sc[h] = alpha * acc_sc[h] + jnp.dot(
                p.astype(v.dtype), v[:, sl], preferred_element_type=jnp.float32)
            m_sc[h] = m_new

    if causal:
        # Fully-masked KV tiles are skipped entirely; the iota/where mask is only
        # built on tiles that straddle the diagonal.
        fully_visible = (ki * tkv + (tkv - 1)) <= (qi * tq)
        needed = (ki * tkv) <= (qi * tq + (tq - 1))
        on_diagonal = jnp.logical_and(needed, jnp.logical_not(fully_visible))

        @pl.when(fully_visible)
        def _():
            tile_update(False)

        @pl.when(on_diagonal)
        def _():
            tile_update(True)
    else:
        tile_update(False)

    @pl.when(ki == pl.num_programs(3) - 1)
    def _():
        for h in range(hb):
            inv = _fast_recip(l_sc[h])                 # softmax divide on EUP
            o_ref[0, :, h * hd:(h + 1) * hd] = (acc_sc[h] * inv).astype(o_ref.dtype)


def attention(q, k, v, *, num_heads, causal=True):
    """q, k, v: (B, S, D) with D = num_heads * head_size, head-interleaved layout
    (column block h*hd:(h+1)*hd = head h). Returns the merged-head context in the
    same layout, so no HBM split/merge transposes are needed."""
    B, S, D = q.shape
    hd = D // num_heads
    hb = _heads_per_block(num_heads, hd)
    n_hblocks = num_heads // hb
    db = hb * hd

    # Flash tiles: 128-256 preferred (v5e MXU fill / v7x VMEM budget); small S
    # gets a single 8-aligned tile.
    tile = _round_up(S, 8) if S <= 512 else 256
    s_pad = _round_up(S, tile)
    kpad = s_pad != S
    if kpad:
        pad = ((0, 0), (0, s_pad - S), (0, 0))
        q = jnp.pad(q, pad)
        k = jnp.pad(k, pad)
        v = jnp.pad(v, pad)
    n_t = s_pad // tile

    kern = functools.partial(
        _flash_attention_kernel, scale=1.0 / math.sqrt(hd), causal=causal,
        hb=hb, hd=hd, tq=tile, tkv=tile, s_valid=S, kpad=kpad)

    out = pl.pallas_call(
        kern,
        out_shape=jax.ShapeDtypeStruct((B, s_pad, D), q.dtype),
        grid_spec=pltpu.PrefetchScalarGridSpec(
            num_scalar_prefetch=0,
            grid=(B, n_hblocks, n_t, n_t),              # KV axis innermost
            in_specs=[
                pl.BlockSpec((1, tile, db), lambda b, h, qi, ki: (b, qi, h)),
                pl.BlockSpec((1, tile, db), lambda b, h, qi, ki: (b, ki, h)),
                pl.BlockSpec((1, tile, db), lambda b, h, qi, ki: (b, ki, h)),
            ],
            out_specs=pl.BlockSpec((1, tile, db), lambda b, h, qi, ki: (b, qi, h)),
            scratch_shapes=[
                pltpu.VMEM((hb, tile, 1), jnp.float32),    # m (running max)
                pltpu.VMEM((hb, tile, 1), jnp.float32),    # l (running denom)
                pltpu.VMEM((hb, tile, hd), jnp.float32),   # acc
            ],
        ),
        compiler_params=pltpu.CompilerParams(
            # >=2 parallel blocks so both v7x TensorCores are used.
            dimension_semantics=("parallel", "parallel", "parallel", "arbitrary"),
            vmem_limit_bytes=32 * 1024 * 1024,
        ),
    )(q, k, v)
    return out[:, :S, :] if kpad else out


# --------------------------------------------------------------------------
# 3) Fused residual add + LayerNorm (unbiased std, eps added to std)
# --------------------------------------------------------------------------
def _add_layernorm_kernel(x_ref, r_ref, w_ref, b_ref, o_ref, *, eps, d_valid):
    x = x_ref[...].astype(jnp.float32) + r_ref[...].astype(jnp.float32)
    mean = jnp.mean(x, axis=-1, keepdims=True)
    diff = x - mean
    # torch.std default: unbiased (divide by N-1); eps added to std (not var)
    var = jnp.sum(diff * diff, axis=-1, keepdims=True) * (1.0 / (d_valid - 1))
    std = jnp.sqrt(var)
    inv = _fast_recip(std + jnp.float32(eps))       # per-row reciprocal on EUP
    w = w_ref[...].astype(jnp.float32)
    b = b_ref[...].astype(jnp.float32)
    o_ref[...] = (diff * (w * inv) + b).astype(o_ref.dtype)


def add_layer_norm(x, residual, weight, bias, *, eps=1e-6, row_tile=1024):
    """LayerNorm(x + residual) over the last dim; x/residual: (..., D)."""
    orig_shape = x.shape
    d = orig_shape[-1]
    x2 = x.reshape(-1, d)
    r2 = residual.reshape(-1, d)
    n_rows = x2.shape[0]

    # 12 MiB budget (3 row-blocks, double-buffered) is safe under v5e's 16 MiB
    # scoped default; vmem_limit_bytes below gives explicit headroom. On v6e the
    # budget can be raised to 48-64 MiB for fewer grid steps.
    vmem_budget = 12 * 1024 * 1024
    max_rows = max(8, vmem_budget // (3 * 2 * d * 4))
    row_tile = min(row_tile, max_rows, _round_up(n_rows, 8))
    row_tile = max(8, (row_tile // 8) * 8)

    n_pad = _round_up(n_rows, row_tile)            # pad tail rows (no divisor req.)
    if n_pad != n_rows:
        # Padded rows compute fast_recip(eps) but are sliced off below.
        x2 = jnp.pad(x2, ((0, n_pad - n_rows), (0, 0)))
        r2 = jnp.pad(r2, ((0, n_pad - n_rows), (0, 0)))

    w2 = weight.reshape(1, d)
    b2 = bias.reshape(1, d)
    kern = functools.partial(_add_layernorm_kernel, eps=eps, d_valid=d)

    out = pl.pallas_call(
        kern,
        out_shape=jax.ShapeDtypeStruct((n_pad, d), x.dtype),
        grid_spec=pltpu.PrefetchScalarGridSpec(
            num_scalar_prefetch=0,
            grid=(n_pad // row_tile,),
            in_specs=[
                pl.BlockSpec((row_tile, d), lambda i: (i, 0)),
                pl.BlockSpec((row_tile, d), lambda i: (i, 0)),
                pl.BlockSpec((1, d), lambda i: (0, 0)),   # resident weight
                pl.BlockSpec((1, d), lambda i: (0, 0)),   # resident bias
            ],
            out_specs=pl.BlockSpec((row_tile, d), lambda i: (i, 0)),
        ),
        compiler_params=pltpu.CompilerParams(
            dimension_semantics=("parallel",),
            vmem_limit_bytes=32 * 1024 * 1024,
        ),
    )(x2, r2, w2, b2)
    return out[:n_rows].reshape(orig_shape)


# --------------------------------------------------------------------------
# Full MultiHeadedAttention forward
# --------------------------------------------------------------------------
def multi_headed_attention(query, key, value, params, *, num_heads,
                           one_direction=True, eps=1e-6):
    B, S, D = query.shape

    self_attn = (query is key) and (key is value)
    q2 = query.reshape(-1, D)
    if self_attn:
        k2 = v2 = q2
    else:
        k2 = key.reshape(-1, D)
        v2 = value.reshape(-1, D)

    q_p, k_p, v_p = qkv_projection(q2, k2, v2, params)

    # Attention runs directly on the (B, S, H*hd) layout — heads are selected via
    # BlockSpec inside the kernel, so no HBM split/merge transposes happen here.
    ctx = attention(q_p.reshape(B, S, D), k_p.reshape(B, S, D),
                    v_p.reshape(B, S, D), num_heads=num_heads,
                    causal=one_direction)

    # dropout p=0.0 and final_layer=False (module defaults) are no-ops.
    # TODO(synk): external `mask`, RelativePositionalEncoding (R_k/R_v einsums),
    # dropout p>0 (pltpu.prng_*) and the optional final Linear are not wired in.
    return add_layer_norm(ctx, query, params["ln_w"], params["ln_b"], eps=eps)


# --------------------------------------------------------------------------
# Pure-JAX reference (same math as the PyTorch forward, default args)
# --------------------------------------------------------------------------
def _reference_mha(query, key, value, params, *, num_heads, one_direction=True, eps=1e-6):
    B, S, D = query.shape
    hd = D // num_heads

    def lin(x, w, b):
        return jnp.dot(x, w) + b

    def split(t):
        return t.reshape(B, S, num_heads, hd).transpose(0, 2, 1, 3)

    q = split(lin(query, params["wq"], params["bq"]))
    k = split(lin(key, params["wk"], params["bk"]))
    v = split(lin(value, params["wv"], params["bv"]))

    # scale folded into q (mathematically identical to scores/sqrt(hd))
    scores = jnp.einsum("bhqd,bhkd->bhqk", q * (1.0 / math.sqrt(hd)), k)
    if one_direction:
        tri = jnp.tril(jnp.ones((S, S), dtype=scores.dtype))
        scores = jnp.where(tri == 0, jnp.float32(-1e9), scores)
    p = jax.nn.softmax(scores, axis=-1)
    x = jnp.einsum("bhqk,bhkd->bhqd", p, v)
    x = x.transpose(0, 2, 1, 3).reshape(B, S, D) + query

    mean = x.mean(-1, keepdims=True)
    std = jnp.sqrt(((x - mean) ** 2).sum(-1, keepdims=True) / (D - 1))
    return params["ln_w"] * (x - mean) / (std + eps) + params["ln_b"]


if __name__ == "__main__":
    rng = jax.random.PRNGKey(0)
    batch, seq, d_model, num_heads = 2, 8, 32, 4
    ks = jax.random.split(rng, 9)

    query = jax.random.normal(ks[0], (batch, seq, d_model), dtype=jnp.float32)
    key_in = jax.random.normal(ks[1], (batch, seq, d_model), dtype=jnp.float32)
    value = jax.random.normal(ks[2], (batch, seq, d_model), dtype=jnp.float32)

    w_scale = 1.0 / math.sqrt(d_model)
    params = {
        "wq": jax.random.normal(ks[3], (d_model, d_model), jnp.float32) * w_scale,
        "bq": jax.random.normal(ks[4], (d_model,), jnp.float32) * 0.1,
        "wk": jax.random.normal(ks[5], (d_model, d_model), jnp.float32) * w_scale,
        "bk": jax.random.normal(ks[6], (d_model,), jnp.float32) * 0.1,
        "wv": jax.random.normal(ks[7], (d_model, d_model), jnp.float32) * w_scale,
        "bv": jax.random.normal(ks[8], (d_model,), jnp.float32) * 0.1,
        # LayerNorm init per the module: ones / zeros
        "ln_w": jnp.ones((d_model,), jnp.float32),
        "ln_b": jnp.zeros((d_model,), jnp.float32),
    }

    # Case 1: distinct q/k/v inputs (exercises the stacked-projection path).
    out = multi_headed_attention(query, key_in, value, params,
                                 num_heads=num_heads, one_direction=True)
    out = jax.block_until_ready(out)
    ref = _reference_mha(query, key_in, value, params,
                         num_heads=num_heads, one_direction=True)
    assert out.shape == ref.shape
    diff = float(jnp.max(jnp.abs(out - ref)))
    assert jnp.allclose(out, ref, atol=2e-3, rtol=2e-3), f"max abs diff {diff}"

    # Case 2: self-attention (q is k is v) -> fused weight-concat projection path.
    out_sa = multi_headed_attention(query, query, query, params,
                                    num_heads=num_heads, one_direction=True)
    out_sa = jax.block_until_ready(out_sa)
    ref_sa = _reference_mha(query, query, query, params,
                            num_heads=num_heads, one_direction=True)
    diff_sa = float(jnp.max(jnp.abs(out_sa - ref_sa)))
    assert jnp.allclose(out_sa, ref_sa, atol=2e-3, rtol=2e-3), f"max abs diff {diff_sa}"

    print("KERNEL_OK")
</pallas_src>

<mosaic_0001>
module attributes {stable_mosaic.version = 11 : i64} {
  func.func @_batched_matmul_bias_kernel(%arg0: i32, %arg1: i32, %arg2: i32, %arg3: i32, %arg4: memref<1x16x128xf32, #tpu.memory_space<vmem>>, %arg5: memref<1x128x128xf32, #tpu.memory_space<vmem>>, %arg6: memref<1x1x128xf32, #tpu.memory_space<vmem>>, %arg7: memref<1x16x128xf32, #tpu.memory_space<vmem>>, %arg8: memref<16x128xf32, #tpu.memory_space<vmem>>) attributes {dimension_semantics = [#tpu.dimension_semantics<parallel>, #tpu.dimension_semantics<parallel>, #tpu.dimension_semantics<parallel>, #tpu.dimension_semantics<arbitrary>], iteration_bounds = array<i64: 3, 1, 1, 1>, scalar_prefetch = 0 : i64, scratch_operands = 1 : i64, tpu.core_type = #tpu.core_type<tc>, window_params = [{transform_indices = @transform_0, window_bounds = array<i64: 1, 16, 128>}, {transform_indices = @transform_1, window_bounds = array<i64: 1, 128, 128>}, {transform_indices = @transform_2, window_bounds = array<i64: 1, 1, 128>}, {transform_indices = @transform_3, window_bounds = array<i64: 1, 16, 128>}]} {
    %c0_i32 = arith.constant 0 : i32
    %0 = arith.cmpi eq, %arg3, %c0_i32 : i32
    %1 = arith.extui %0 : i1 to i32
    %c0_i32_0 = arith.constant 0 : i32
    %2 = arith.cmpi ne, %1, %c0_i32_0 : i32
    scf.if %2 {
      %cst_12 = arith.constant 0.000000e+00 : f32
      %14 = vector.broadcast %cst_12 : f32 to vector<16x128xf32>
      %c0_13 = arith.constant 0 : index
      %c0_14 = arith.constant 0 : index
      %15 = vector.load %arg8[%c0_13, %c0_14] : memref<16x128xf32, #tpu.memory_space<vmem>>, vector<16x128xf32>
      tpu.vector_store %arg8[%c0_13, %c0_14], %14 {strides = array<i32>} : memref<16x128xf32, #tpu.memory_space<vmem>>, vector<16x128xf32>,
    } else {
    }
    %c0 = arith.constant 0 : index
    %c0_1 = arith.constant 0 : index
    %3 = vector.load %arg8[%c0, %c0_1] : memref<16x128xf32, #tpu.memory_space<vmem>>, vector<16x128xf32>
    %c0_2 = arith.constant 0 : index
    %c0_3 = arith.constant 0 : index
    %c0_4 = arith.constant 0 : index
    %4 = vector.load %arg4[%c0_2, %c0_3, %c0_4] : memref<1x16x128xf32, #tpu.memory_space<vmem>>, vector<1x16x128xf32>
    %5 = vector.shape_cast %4 : vector<1x16x128xf32> to vector<16x128xf32>
    %c0_5 = arith.constant 0 : index
    %c0_6 = arith.constant 0 : index
    %c0_7 = arith.constant 0 : index
    %6 = vector.load %arg5[%c0_5, %c0_6, %c0_7] : memref<1x128x128xf32, #tpu.memory_space<vmem>>, vector<1x128x128xf32>
    %7 = vector.shape_cast %6 : vector<1x128x128xf32> to vector<128x128xf32>
    %cst = arith.constant dense<0.000000e+00> : vector<16x128xf32>
    %8 = tpu.matmul %5, %7, %cst {dimension_numbers = #tpu.dot_dimension_numbers<[1], [0], [0], [1], [0, 0, 1, 1], [], []>} : vector<16x128xf32>, vector<128x128xf32>, vector<16x128xf32> -> vector<16x128xf32>
    %9 = arith.addf %3, %8 : vector<16x128xf32>
    %c0_8 = arith.constant 0 : index
    %c0_9 = arith.constant 0 : index
    %10 = vector.load %arg8[%c0_8, %c0_9] : memref<16x128xf32, #tpu.memory_space<vmem>>, vector<16x128xf32>
    tpu.vector_store %arg8[%c0_8, %c0_9], %9 {strides = array<i32>} : memref<16x128xf32, #tpu.memory_space<vmem>>, vector<16x128xf32>,
    %c0_i32_10 = arith.constant 0 : i32
    %11 = arith.cmpi eq, %arg3, %c0_i32_10 : i32
    %12 = arith.extui %11 : i1 to i32
    %c0_i32_11 = arith.constant 0 : i32
    %13 = arith.cmpi ne, %12, %c0_i32_11 : i32
    scf.if %13 {
      %c0_12 = arith.constant 0 : index
      %c0_13 = arith.constant 0 : index
      %14 = vector.load %arg8[%c0_12, %c0_13] : memref<16x128xf32, #tpu.memory_space<vmem>>, vector<16x128xf32>
      %c0_14 = arith.constant 0 : index
      %c0_15 = arith.constant 0 : index
      %c0_16 = arith.constant 0 : index
      %15 = vector.load %arg6[%c0_14, %c0_15, %c0_16] : memref<1x1x128xf32, #tpu.memory_space<vmem>>, vector<1x1x128xf32>
      %16 = vector.shape_cast %15 : vector<1x1x128xf32> to vector<1x128xf32>
      %17 = vector.broadcast %16 : vector<1x128xf32> to vector<16x128xf32>
      %18 = arith.addf %14, %17 : vector<16x128xf32>
      %c0_17 = arith.constant 0 : index
      %c0_18 = arith.constant 0 : index
      %c0_19 = arith.constant 0 : index
      %19 = vector.load %arg7[%c0_17, %c0_18, %c0_19] : memref<1x16x128xf32, #tpu.memory_space<vmem>>, vector<1x16x128xf32>
      %20 = vector.shape_cast %19 : vector<1x16x128xf32> to vector<16x128xf32>
      %21 = vector.shape_cast %18 : vector<16x128xf32> to vector<1x16x128xf32>
      tpu.vector_store %arg7[%c0_17, %c0_18, %c0_19], %21 {strides = array<i32>} : memref<1x16x128xf32, #tpu.memory_space<vmem>>, vector<1x16x128xf32>,
    } else {
    }
    return
  }
  func.func @transform_0(%arg0: i32, %arg1: i32, %arg2: i32, %arg3: i32) -> (i32, i32, i32) {
    %c0_i32 = arith.constant 0 : i32
    return %arg0, %arg1, %arg3 : i32, i32, i32
  }
  func.func @transform_1(%arg0: i32, %arg1: i32, %arg2: i32, %arg3: i32) -> (i32, i32, i32) {
    %c0_i32 = arith.constant 0 : i32
    return %arg0, %arg3, %arg2 : i32, i32, i32
  }
  func.func @transform_2(%arg0: i32, %arg1: i32, %arg2: i32, %arg3: i32) -> (i32, i32, i32) {
    %c0_i32 = arith.constant 0 : i32
    %c0_i32_0 = arith.constant 0 : i32
    return %arg0, %c0_i32, %arg2 : i32, i32, i32
  }
  func.func @transform_3(%arg0: i32, %arg1: i32, %arg2: i32, %arg3: i32) -> (i32, i32, i32) {
    %c0_i32 = arith.constant 0 : i32
    return %arg0, %arg1, %arg2 : i32, i32, i32
  }
}

</mosaic_0001>

<bundles_post_ra>
// kernel: tpu_custom_call.1
= control target key start
LH: loop header
LB: loop body
LE: loop exit
PB: predicated region body
PF: predicated region fallthrough
CT: control target
= control target key end

     0   :  { %s1094_s0 = inlined_call_operand.hbm [shape: f32[3,16,128], index: 0, kind: input, shape index: {}]   ;;  %s1095_s1 = inlined_call_operand.hbm [shape: f32[3,128,128], index: 1, kind: input, shape index: {}]   ;;  %s1096_s2 = inlined_call_operand.vmem [shape: f32[3,1,128], index: 2, kind: input, shape index: {}]   ;;  %s1097_s3 = inlined_call_operand.hbm [shape: f32[3,16,128], index: 3, kind: output, shape index: {}]  }
   0x1   :  { %1098 = sst [smem:[#allocation12_spill]] %s1094_s0 }
   0x2   :  { %8 = vsyncpa [#allocation4], 0 }
   0x3   :  { %10 = vsyncpa [#allocation4 + $0x1], 0 }
   0x4   :  { %11 = vsyncpa [#allocation7], 0 }
   0x5   :  { %13 = vsyncpa [#allocation7 + $0x1], 0 }
   0x6   :  { %14 = vsyncpa [#allocation5], 0 }
   0x7   :  { %16 = vsyncpa [#allocation5 + $0x1], 0  ;;  %s889_s12 = smov 0   ;;  %s891_s13 = smov 0  }
   0x8   :  { %s893_s14 = smov 0   ;;  %s895_s15 = smov 0  }
   0x9   :  { %s897_s16 = smov 0   ;;  %s899_s17 = smov 0  }
   0xa LB: > { %s573_s18 = sadd.s32 4294967295, %s860_s17   ;;  %s574_s19 = sadd.s32 4294967294, %s860_s17   ;;  %s860_s17 = sphi %s899_s17, %s22_s17   ;;  %s856_s16 = sphi %s897_s16, %s1110_s16   ;;  %s852_s15 = sphi %s895_s15, %s1109_s15   ;;  %s848_s14 = sphi %s893_s14, %s1108_s14   ;;  %s844_s13 = sphi %s891_s13, %s1107_s13   ;;  %s840_s12 = sphi %s889_s12, %s1106_s12  }
   0xb   : > { %s48_s20 = sadd.s32 1, %s856_s16  ;;  %s59_s21 = sadd.s32 1, %s848_s14 }
   0xc   : > { %p50_p0 = scmp.ge.s32.totalorder %s48_s20, 3  ;;  %p66_p1 = scmp.ne.s32.totalorder %s848_s14, %s844_s13 }
   0xd   : > { %p67_p2 = scmp.eq.s32.totalorder %s860_s17, 0  ;;  %p72_p3 = scmp.ne.s32.totalorder %s844_s13, %s840_s12 }
   0xe   : > { %s1112_s20 = smov (%p50_p0, %s48_s20), 0  ;;  %p73_p5 = scmp.eq.s32.totalorder %s573_s18, 0 }
   0xf   : > { %p930_p4 = por %p67_p2, %p66_p1  ;;  %s52_s23 = ssub.s32 %s856_s16, %s1112_s20 }
  0x10   : > { %p158_p6 = scmp.eq.s32.totalorder %s573_s18, 2  ;;  %p57_p7 = scmp.eq.s32.totalorder %s52_s23, 0 }
  0x11   : > { %p936_p8 = por %p73_p5, %p72_p3  ;;  %p164_p10 = scmp.eq.s32.totalorder %s574_s19, 2 }
  0x12   : > { %p940_p9 = por %p158_p6, %p66_p1  ;;  %p666_p12 = scmp.lt.s32.totalorder %s860_s17, 3 }
  0x13   : > { %s945_s26 = scalar_select %p57_p7, %s848_s14, %s59_s21  }
  0x14   : > { %p947_p11 = por %p164_p10, %p72_p3  ;;  %s953_s28 = sand.u32 1, %s848_s14  }
  0x15   : > { %s577_s29 = sshll.u32 %s953_s28, 4  ;;  %s593_s30 = sshll.u32 %s856_s16, 8 }
  0x16   : > { %s1103_s0 = sld [smem:[#allocation12_spill]]  ;;  %s188_s7 = scalar_lea.vmem [#allocation3], %s577_s29 }
  0x17   : > { %s198_s8 = sshll.u32 %s188_s7, 4  ;;  %p962_p13 = pnand %p666_p12, %p930_p4  ;;  %s199_s8 = int_to_ptr.vmem [resolvable:$true] %s198_s8 }
  0x18   : > { %p583_p0 = scmp.ge.s32.totalorder %s860_s17, 1  ;;  %s185_s10 = scalar_lea.sflag [#allocation4], %s953_s28 }
  0x19   : > { %p722_p1 = pneg %p962_p13  ;;  %s733_s11 = scalar_lea.vmem %s199_s8, 256 }
  0x1a   : > { %p734_p2 = scmp.ne.s32.totalorder %s199_s8, %s733_s11  ;;  %s862_s18 = smov [#allocation3]  }
  0x1b   : > { %s738_s19 = sshll.u32 %s862_s18, 4  ;;  %s739_s19 = int_to_ptr.vmem [resolvable:$false] %s738_s19 }
  0x1c   : > { %s197_s6 = scalar_lea.hbm %s1103_s0, %s593_s30  ;;  %p736_p3 = pnand %p734_p2, %p722_p1 }
  0x1d   : > { %s740_s21 = scalar_lea.vmem %s739_s19, 512  ;;  %p741_p4 = scmp.lt.s32.totalorder %s199_s8, %s739_s19 }
  0x1e   : > { %p737_p5 = pneg %p736_p3  ;;  %p742_p6 = scmp.lt.s32.totalorder %s740_s21, %s733_s11 }
  0x20   : > { %p743_p7 = por %p742_p6, %p741_p4 }
  0x22   : > { %p744_p10 = pnand %p743_p7, %p737_p5 }
  0x24   : > { %747 = shalt.err (!%p744_p10)
}
  0x25   : > { %s863_s22 = smov 128   ;;  %s864_s23 = smov 8  }
  0x26   : > { %658 = dma.hbm_to_vmem [thread:$0]  (!%p962_p13), %s197_s6, 256, %s199_s8, %s185_s10, %s863_s22, %s863_s22, %s864_s23  }
  0x27   : > { %p239_p12 = scmp.lt.s32.totalorder %s860_s17, 4  ;;  %s580_s29 = sshll.u32 %s953_s28, 7 }
  0x28   : > { %s594_s30 = sshll.u32 %s856_s16, 11  ;;  %s212_s18 = scalar_lea.vmem [#allocation6], %s580_s29 }
  0x29   : > { %p980_p2 = pnand %p583_p0, %p239_p12  ;;  %s221_s11 = scalar_lea.hbm %s1095_s1, %s594_s30 }
  0x2a   : > { %s222_s19 = sshll.u32 %s212_s18, 4  ;;  %s209_s21 = scalar_lea.sflag [#allocation7], %s953_s28  ;;  %s223_s19 = int_to_ptr.vmem [resolvable:$true] %s222_s19 }
  0x2b   : > { %s761_s0 = scalar_lea.vmem %s223_s19, 2048  ;;  %s865_s6 = smov [#allocation6]  }
  0x2c   : > { %p762_p3 = scmp.ne.s32.totalorder %s223_s19, %s761_s0  ;;  %s766_s8 = sshll.u32 %s865_s6, 4  ;;  %s767_s8 = int_to_ptr.vmem [resolvable:$false] %s766_s8 }
  0x2d   : > { %s768_s10 = scalar_lea.vmem %s767_s8, 4096  ;;  %p769_p0 = scmp.lt.s32.totalorder %s223_s19, %s767_s8 }
  0x2e   : > { %p764_p5 = pnand %p762_p3, %p722_p1  ;;  %p770_p6 = scmp.lt.s32.totalorder %s768_s10, %s761_s0 }
  0x30   : > { %p765_p4 = pneg %p764_p5  ;;  %p771_p7 = por %p770_p6, %p769_p0 }
  0x32   : > { %p772_p10 = pnand %p771_p7, %p765_p4 }
  0x34   : > { %775 = shalt.err (!%p772_p10)
}
  0x35   : > { %661 = dma.hbm_to_vmem [thread:$0]  (!%p962_p13), %s221_s11, 2048, %s223_s19, %s209_s21, %s863_s22, %s863_s22, %s864_s23  }
  0x36   : > { %243 = sbr.rel (%p980_p2) target bundleno = 307 (0x133), region = 32  ;;  %s996_s28 = sand.u32 (!%p980_p2), 1, %s844_s13  }
  0x37   : > { %s584_s29 = sshll.u32 (!%p980_p2), %s996_s28, 4  ;;  %s246_s30 = scalar_lea.sflag (!%p980_p2), [#allocation4], %s996_s28 }
  0x38   : > { %s1002_s0 = scalar_lea.vmem (!%p980_p2), [#allocation3], %s584_s29 }
  0x3b   : > { %827 = dma.done.wait (%p936_p8), %s246_s30, 256  }
  0x3c   : > { %829 = vsyncadd (%p936_p8), %s246_s30, 4294967040  ;;  %s585_s9 = sshll.u32 %s996_s28, 7  ;;  %s255_s22 = scalar_lea.sflag [#allocation7], %s996_s28 }
  0x3d   : > { %s1010_s23 = scalar_lea.vmem [#allocation6], %s585_s9 }
  0x3e   : > { %831 = dma.done.wait (%p936_p8), %s255_s22, 2048  }
  0x3f   : > { %833 = vsyncadd (%p936_p8), %s255_s22, 4294965248  ;;  %v326_v0 = vld [vmem:[%s1010_s23 + $0x78] sm:$0xff]  ;;  %v325_v1 = vld [vmem:[%s1010_s23 + $0x70] sm:$0xff]  ;;  %p294_p8 = scmp.lt.s32.totalorder %s852_s15, 2  ;;  %s291_s11 = scalar_lea.vmem [#allocation8], %s584_s29 }
  0x40   : > { %614 = vmatprep.subr.mxu0 %v326_v0  ;;  %v324_v2 = vld [vmem:[%s1010_s23 + $0x68] sm:$0xff]  ;;  %v323_v3 = vld [vmem:[%s1010_s23 + $0x60] sm:$0xff]  ;;  %v322_v5 = vld [vmem:[%s1010_s23 + $0x58] sm:$0xff]  ;;  %s439_s18 = sshll.u32 %s291_s11, 4  ;;  %s595_s19 = sshll.u32 %s852_s15, 8  ;;  %s1042_s18 = int_to_ptr.vmem [resolvable:$true] %s439_s18 }
  0x41   : > { %615 = vmatpush3.msra.mxu0 %v326_v0  ;;  %v309_v4 = vld [vmem:[%s1002_s0] sm:$0xff]  ;;  %v320_v7 = vld [vmem:[%s1010_s23 + $0x48] sm:$0xff]  ;;  %v318_v9 = vld [vmem:[%s1010_s23 + $0x38] sm:$0xff]  ;;  %s295_s24 = scalar_select %p294_p8, %s852_s15, 2 }
  0x42   : > { %616 = vmatprep.subr.mxu0 %v325_v1  ;;  %646 = vmatprep.mubr.f32.mxu0 %v309_v4  ;;  %v321_v6 = vld [vmem:[%s1010_s23 + $0x50] sm:$0xff]  ;;  %v319_v8 = vld [vmem:[%s1010_s23 + $0x40] sm:$0xff]  ;;  %v316_v11 = vld [vmem:[%s1010_s23 + $0x28] sm:$0xff]  ;;  %s1047_s8 = scalar_lea.hbm %s1097_s3, %s595_s19  ;;  %s423_s10 = scalar_lea.sflag [#allocation5], %s996_s28 }
  0x43   : > { %617 = vmatpush3.msra.mxu0 %v325_v1  ;;  %v317_v10 = vld [vmem:[%s1010_s23 + $0x30] sm:$0xff]  ;;  %v315_v12 = vld [vmem:[%s1010_s23 + $0x20] sm:$0xff]  ;;  %v314_v13 = vld [vmem:[%s1010_s23 + $0x18] sm:$0xff]  ;;  %s299_s7 = scalar_lea.vmem %s1096_s2, %s295_s24  ;;  %s776_s29 = scalar_lea.vmem %s1042_s18, 256 }
  0x44   : > { %618 = vmatprep.subr.mxu0 %v324_v2  ;;  %v313_v14 = vld [vmem:[%s1010_s23 + $0x10] sm:$0xff]  ;;  %v312_v15 = vld [vmem:[%s1010_s23 + $0x8] sm:$0xff]  ;;  %v311_v16 = vld [vmem:[%s1010_s23] sm:$0xff]  ;;  %p777_p13 = scmp.ne.s32.totalorder %s1042_s18, %s776_s29  ;;  %s866_s15 = smov [#allocation8]  }
  0x45   : > { %619 = vmatpush3.msra.mxu0 %v324_v2  ;;  %v310_v17 = vld [vmem:[%s1002_s0 + $0x8] sm:$0xff]  ;;  %v587_v18 = vld [vmem:[%s299_s7] ss:$0 sm:$0xff]  ;;  %s780_s30 = sshll.u32 %s866_s15, 4  ;;  %s781_s30 = int_to_ptr.vmem [resolvable:$false] %s780_s30 }
  0x46   : > { %620 = vmatprep.subr.mxu0 %v323_v3  ;;  %p778_p1 = pnand %p777_p13, %p940_p9  ;;  %s782_s0 = scalar_lea.vmem %s781_s30, 512 }
  0x47   : > { %621 = vmatpush3.msra.mxu0 %v323_v3  ;;  %p783_p2 = scmp.lt.s32.totalorder %s1042_s18, %s781_s30  ;;  %p784_p3 = scmp.lt.s32.totalorder %s782_s0, %s776_s29 }
  0x48   : > { %622 = vmatprep.subr.mxu0 %v322_v5  ;;  %p779_p12 = pneg %p778_p1 }
  0x49   : > { %623 = vmatpush3.msra.mxu0 %v322_v5  ;;  %p785_p5 = por %p784_p3, %p783_p2 }
  0x4a   : > { %624 = vmatprep.subr.mxu0 %v321_v6 }
  0x4b   : > { %625 = vmatpush3.msra.mxu0 %v321_v6  ;;  %p786_p4 = pnand %p785_p5, %p779_p12 }
  0x4c   : > { %626 = vmatprep.subr.mxu0 %v320_v7 }
  0x4d   : > { %627 = vmatpush3.msra.mxu0 %v320_v7 }
  0x4e   : > { %628 = vmatprep.subr.mxu0 %v319_v8 }
  0x4f   : > { %629 = vmatpush3.msra.mxu0 %v319_v8 }
  0x50   : > { %630 = vmatprep.subr.mxu0 %v318_v9 }
  0x51   : > { %631 = vmatpush3.msra.mxu0 %v318_v9 }
  0x52   : > { %632 = vmatprep.subr.mxu0 %v317_v10 }
  0x53   : > { %633 = vmatpush3.msra.mxu0 %v317_v10 }
  0x54   : > { %634 = vmatprep.subr.mxu0 %v316_v11 }
  0x55   : > { %635 = vmatpush3.msra.mxu0 %v316_v11 }
  0x56   : > { %636 = vmatprep.subr.mxu0 %v315_v12 }
  0x57   : > { %637 = vmatpush3.msra.mxu0 %v315_v12 }
  0x58   : > { %638 = vmatprep.subr.mxu0 %v314_v13 }
  0x59   : > { %639 = vmatpush3.msra.mxu0 %v314_v13 }
  0x5a   : > { %640 = vmatprep.subr.mxu0 %v313_v14 }
  0x5b   : > { %641 = vmatpush3.msra.mxu0 %v313_v14 }
  0x5c   : > { %642 = vmatprep.subr.mxu0 %v312_v15 }
  0x5d   : > { %643 = vmatpush3.msra.mxu0 %v312_v15 }
  0x5e   : > { %644 = vmatprep.subr.mxu0 %v311_v16 }
  0x5f   : > { %645 = vmatpush3.msra.mxu0 %v311_v16 }
  0x60   : > { %647 = vmatmul.mubr.f32.vlgmr.msra.gmra.mxu0 %v310_v17 }
 0x120   : > { %v648_v19 = vpop.f32.mrf.mxu0 }
 0x121   : > { %v419_v20 = vadd.f32 %v648_v19, %v587_v18 }
 0x122   : > { %v393_v21 = vpop.f32.mrf.mxu0 }
 0x123   : > { %421 = vst [vmem:[%s291_s11 + $0x8] sm:$0xff] %v419_v20  ;;  %v418_v22 = vadd.f32 %v587_v18, %v393_v21 }
 0x125   : > { %420 = vst [vmem:[%s291_s11] sm:$0xff] %v418_v22 }
 0x126   : > { %789 = shalt.err (!%p786_p4)
}
 0x127   : > { %s790_s9 = scalar_lea.hbm %s1047_s8, 256  ;;  %s794_s24 = scalar_lea.hbm %s1097_s3, 768 }
 0x128   : > { %p791_p0 = scmp.ne.s32.totalorder %s1047_s8, %s790_s9  ;;  %p795_p10 = scmp.lt.s32.totalorder %s1047_s8, %s1097_s3 }
 0x129   : > { %p796_p8 = scmp.lt.s32.totalorder %s794_s24, %s790_s9 }
 0x12a   : > { %p792_p6 = pnand %p791_p0, %p940_p9 }
 0x12b   : > { %p797_p13 = por %p796_p8, %p795_p10 }
 0x12c   : > { %p793_p7 = pneg %p792_p6 }
 0x12e   : > { %p798_p1 = pnand %p797_p13, %p793_p7 }
 0x130   : > { %801 = shalt.err (!%p798_p1)
}
 0x131   : > { %s867_s7 = smov 128   ;;  %s868_s11 = smov 8  }
 0x132   : > { %653 = dma.vmem_to_hbm [thread:$0]  (%p940_p9), %s1042_s18, 256, %s1047_s8, %s423_s10, %s867_s7, %s867_s7, %s868_s11  }
 0x133 PF: > { %p667_p12 = scmp.ge.s32.totalorder %s860_s17, 2  ;;  %s454_s19 = sand.u32 1, %s840_s12  }
 0x134   : > { %s455_s21 = scalar_lea.sflag [#allocation5], %s454_s19 }
 0x135   : > { %p663_p2 = pnand %p667_p12, %p947_p11 }
 0x137   : > { %p664_p3 = pneg %p663_p2 }
 0x139   : > { %835 = dma.done.wait (%p664_p3), %s455_s21, 256  }
 0x13a   : > { %837 = vsyncadd (%p664_p3), %s455_s21, 4294967040  ;;  %s22_s17 = sadd.s32 1, %s860_s17   ;;  %s1106_s12 = smov %s844_s13 }
 0x13b   : > { %p19_p5 = scmp.ge.s32.totalorder %s22_s17, 5   ;;  %s1107_s13 = smov %s848_s14 }
 0x13c   : > { %s1108_s14 = smov %s945_s26  ;;  %s1109_s15 = smov %s856_s16 }
 0x13d   : > { %s1110_s16 = smov %s1112_s20  ;;  %21 = sbr.rel (!%p19_p5) target bundleno = 10 (0xa), region = 101 }
 0x142   :  { %460 = vsyncpa [#allocation4], 1 }
 0x143   :  { %462 = vsyncpa [#allocation4 + $0x1], 1 }
 0x144   :  { %463 = vsyncpa [#allocation7], 1 }
 0x145   :  { %465 = vsyncpa [#allocation7 + $0x1], 1 }
 0x146   :  { %466 = vsyncpa [#allocation5], 1 }
 0x147   :  { %468 = vsyncpa [#allocation5 + $0x1], 1 }

</bundles_post_ra>
